<compile_context>
chip_gen: v6e
topology: v6e:2x2x1
jax: 0.10.0
libtpu: 0.0.40
codegen_flags: <defaults>
</compile_context>

<pallas_src>
import re

import jax
import jax.numpy as jnp
from jax.experimental import pallas as pl
from jax.experimental.pallas import tpu as pltpu

HIDDEN = 32  # args.hidden_neuron


def _round_up(x, m):
    return ((x + m - 1) // m) * m


def _tpu_generation():
    """Best-effort TPU generation (5, 6, 7, ...). Returns 0 if unknown."""
    try:
        kind = jax.devices()[0].device_kind      # e.g. "TPU v5 lite", "TPU v6e"
        m = re.search(r"v(\d+)", kind)
        return int(m.group(1)) if m else 0
    except Exception:
        return 0


def _make_mlp_kernel(bf16_tanh: bool):
    def mlp_kernel(yT_ref, w1_ref, b1_ref, w2t_ref, b2_ref, oT_ref):
        # Feature-major (lane-dense) layout:
        #   yT:  (2, TB)   w1: (H, 2)   b1: (H, 1)
        #   w2t: (H, 2)    b2: (2, 1)   oT: (2, TB)
        yT = yT_ref[...]
        w1 = w1_ref[...]
        b1 = b1_ref[...]
        w2t = w2t_ref[...]
        b2 = b2_ref[...]

        y0 = yT[0:1, :]                                    # (1, TB)
        y1 = yT[1:2, :]                                    # (1, TB)

        # Layer 1: K=2 -> two broadcast FMAs on the VPU (MXU would be <2% utilized).
        pre = w1[:, 0:1] * y0 + w1[:, 1:2] * y1 + b1       # (H, TB) f32
        if bf16_tanh:
            # Binding unit is the single EUP; packed bf16 tanh roughly doubles
            # its throughput on v6e/v7x.  Accumulation stays f32.
            h = jnp.tanh(pre.astype(jnp.bfloat16)).astype(jnp.float32)
        else:
            h = jnp.tanh(pre)                              # (H, TB)

        # Layer 2: N=2 -> VPU multiply + cross-sublane (XLU) reduce over H.
        # (Two reads of h; XLU/VALU have slack under the EUP-bound regime.)
        out0 = jnp.sum(w2t[:, 0:1] * h, axis=0, keepdims=True) + b2[0:1, :]   # (1, TB)
        out1 = jnp.sum(w2t[:, 1:2] * h, axis=0, keepdims=True) + b2[1:2, :]   # (1, TB)

        # Store rows directly -> no extra (2, TB) VMEM temporary.
        oT_ref[0:1, :] = out0.astype(oT_ref.dtype)
        oT_ref[1:2, :] = out1.astype(oT_ref.dtype)

    return mlp_kernel


def mlp_forward_fm(t, yT, params, *, block_b=8192):
    """Feature-major Pallas forward (primary path).

    yT: (2, B)  ->  out: (2, B).  `t` is ignored, matching forward(t, y).
    No host-side pad/transpose: ragged last block is edge-masked by Pallas.
    """
    del t
    w1, b1, w2t, b2 = params
    H = w1.shape[0]
    B = yT.shape[1]

    # Lane-dense tile, multiple of 128; >=2 grid steps whenever B > 128 so the
    # "parallel" batch axis shards across v7x's two TensorCores; capped at
    # block_b (default 8192 keeps the (H, TB) f32 temporaries well inside
    # v7x's 64 MiB VMEM while amortizing per-step overhead on v5e/v6e).
    tb_target = _round_up(-(-B // 2), 128)
    TB = max(128, min(block_b, tb_target))
    grid = (pl.cdiv(B, TB),)

    bf16_tanh = _tpu_generation() >= 6          # v5e has no bf16 EUP -> stay f32

    out_T = pl.pallas_call(
        _make_mlp_kernel(bf16_tanh),
        out_shape=jax.ShapeDtypeStruct((2, B), yT.dtype),
        grid_spec=pltpu.PrefetchScalarGridSpec(
            num_scalar_prefetch=0,
            grid=grid,
            in_specs=[
                pl.BlockSpec((2, TB), lambda i: (0, i)),   # streamed activations
                pl.BlockSpec((H, 2), lambda i: (0, 0)),    # weights stay resident
                pl.BlockSpec((H, 1), lambda i: (0, 0)),
                pl.BlockSpec((H, 2), lambda i: (0, 0)),
                pl.BlockSpec((2, 1), lambda i: (0, 0)),
            ],
            out_specs=pl.BlockSpec((2, TB), lambda i: (0, i)),
        ),
        compiler_params=pltpu.CompilerParams(
            dimension_semantics=("parallel",),             # megacore on v7x, no-op elsewhere
            vmem_limit_bytes=32 * 1024 * 1024,             # safe on v5e/v6e/v7x; usage << limit
        ),
    )(yT, w1, b1, w2t, b2)

    return out_T


def mlp_forward(t, y, params, *, block_b=8192):
    """Drop-in (B, 2) -> (B, 2) wrapper matching the PyTorch forward(t, y).

    Prefer mlp_forward_fm and keep activations feature-major end-to-end:
    each transpose here is a standalone XLA HBM read+write.
    """
    # TODO(synk): for tiny batches (B <~ 2-4K, e.g. cubic_fit's B=8..300) fuse
    # several MLP evaluations (RK stages / time steps) into one pallas_call at
    # the call site; launch + DMA overhead dominates a single sub-us evaluation.
    return mlp_forward_fm(t, y.T, params, block_b=block_b).T


def init_params(key, hidden=HIDDEN, dtype=jnp.float32):
    """Deterministic init matching nn.init.normal_(std=0.1) and zero biases.

    Storage is feature-major for the kernel:
      w1  = Linear(2, H).weight        -> (H, 2)
      b1  = Linear(2, H).bias          -> (H, 1)
      w2t = Linear(H, 2).weight.T      -> (H, 2)
      b2  = Linear(H, 2).bias          -> (2, 1)
    """
    k1, k2 = jax.random.split(key)
    w1 = (0.1 * jax.random.normal(k1, (hidden, 2))).astype(dtype)
    b1 = jnp.zeros((hidden, 1), dtype)
    w2t = (0.1 * jax.random.normal(k2, (2, hidden))).astype(dtype).T
    b2 = jnp.zeros((2, 1), dtype)
    return w1, b1, w2t, b2


def mlp_reference(t, y, params):
    """Pure-JAX reference (batch-major) for correctness checking."""
    del t
    w1, b1, w2t, b2 = params
    h = jnp.tanh(y @ w1.T + b1.T)      # (B, H)
    return h @ w2t + b2.T              # (B, 2)


if __name__ == "__main__":
    key = jax.random.PRNGKey(0)
    kp, kt, ky, ky2 = jax.random.split(key, 4)

    params = init_params(kp, hidden=HIDDEN)

    # bf16 tanh on gen>=6 chips trades ~1e-3 abs error for ~2x EUP throughput.
    bf16_active = _tpu_generation() >= 6
    atol = 1e-2 if bf16_active else 1e-5
    rtol = 1e-2 if bf16_active else 1e-5

    # Case 1: small batch through the drop-in (B, 2) API (single ragged block).
    batch = 8
    t = jax.random.uniform(kt, (batch, 1), jnp.float32)   # unused, mirrors forward(t, y)
    y = jax.random.normal(ky, (batch, 2), jnp.float32)
    out = jax.block_until_ready(mlp_forward(t, y, params))
    ref = mlp_reference(t, y, params)
    assert out.shape == (batch, 2)
    assert jnp.allclose(out, ref, atol=atol, rtol=rtol), "mismatch vs reference (batch=8)"

    # Case 2: feature-major primary path, multi-step grid + ragged last block
    # (B=300 -> TB=256, grid=(2,), no host-side pad or transpose).
    batch2 = 300
    yT2 = jax.random.normal(ky2, (2, batch2), jnp.float32)
    outT2 = jax.block_until_ready(mlp_forward_fm(None, yT2, params))
    ref2 = mlp_reference(None, yT2.T, params)
    assert outT2.shape == (2, batch2)
    assert jnp.allclose(outT2.T, ref2, atol=atol, rtol=rtol), "mismatch vs reference (batch=300)"

    print("KERNEL_OK")
</pallas_src>

<mosaic_0001>
module attributes {stable_mosaic.version = 11 : i64} {
  func.func @mlp_kernel(%arg0: i32, %arg1: memref<2x128xf32, #tpu.memory_space<vmem>>, %arg2: memref<32x2xf32, #tpu.memory_space<vmem>>, %arg3: memref<32x1xf32, #tpu.memory_space<vmem>>, %arg4: memref<32x2xf32, #tpu.memory_space<vmem>>, %arg5: memref<2x1xf32, #tpu.memory_space<vmem>>, %arg6: memref<2x128xf32, #tpu.memory_space<vmem>>) attributes {dimension_semantics = [#tpu.dimension_semantics<parallel>], iteration_bounds = array<i64: 1>, scalar_prefetch = 0 : i64, scratch_operands = 0 : i64, tpu.core_type = #tpu.core_type<tc>, window_params = [{transform_indices = @transform_0, window_bounds = array<i64: 2, 128>}, {pipeline_mode = #tpu.pipeline_mode<synchronous>, transform_indices = @transform_1, window_bounds = array<i64: 32, 2>}, {pipeline_mode = #tpu.pipeline_mode<synchronous>, transform_indices = @transform_2, window_bounds = array<i64: 32, 1>}, {pipeline_mode = #tpu.pipeline_mode<synchronous>, transform_indices = @transform_3, window_bounds = array<i64: 32, 2>}, {pipeline_mode = #tpu.pipeline_mode<synchronous>, transform_indices = @transform_4, window_bounds = array<i64: 2, 1>}, {transform_indices = @transform_5, window_bounds = array<i64: 2, 128>}]} {
    %c0 = arith.constant 0 : index
    %c0_0 = arith.constant 0 : index
    %0 = vector.load %arg1[%c0, %c0_0] : memref<2x128xf32, #tpu.memory_space<vmem>>, vector<2x128xf32>
    %c0_1 = arith.constant 0 : index
    %c0_2 = arith.constant 0 : index
    %1 = vector.load %arg2[%c0_1, %c0_2] : memref<32x2xf32, #tpu.memory_space<vmem>>, vector<32x2xf32>
    %c0_3 = arith.constant 0 : index
    %c0_4 = arith.constant 0 : index
    %2 = vector.load %arg3[%c0_3, %c0_4] : memref<32x1xf32, #tpu.memory_space<vmem>>, vector<32x1xf32>
    %c0_5 = arith.constant 0 : index
    %c0_6 = arith.constant 0 : index
    %3 = vector.load %arg4[%c0_5, %c0_6] : memref<32x2xf32, #tpu.memory_space<vmem>>, vector<32x2xf32>
    %c0_7 = arith.constant 0 : index
    %c0_8 = arith.constant 0 : index
    %4 = vector.load %arg5[%c0_7, %c0_8] : memref<2x1xf32, #tpu.memory_space<vmem>>, vector<2x1xf32>
    %5 = vector.extract_strided_slice %0 {offsets = [0, 0], sizes = [1, 128], strides = [1, 1]} : vector<2x128xf32> to vector<1x128xf32>
    %6 = vector.extract_strided_slice %0 {offsets = [1, 0], sizes = [1, 128], strides = [1, 1]} : vector<2x128xf32> to vector<1x128xf32>
    %7 = vector.extract_strided_slice %1 {offsets = [0, 0], sizes = [32, 1], strides = [1, 1]} : vector<32x2xf32> to vector<32x1xf32>
    %8 = vector.broadcast %7 : vector<32x1xf32> to vector<32x128xf32>
    %9 = vector.broadcast %5 : vector<1x128xf32> to vector<32x128xf32>
    %10 = arith.mulf %8, %9 : vector<32x128xf32>
    %11 = vector.extract_strided_slice %1 {offsets = [0, 1], sizes = [32, 1], strides = [1, 1]} : vector<32x2xf32> to vector<32x1xf32>
    %12 = vector.broadcast %11 : vector<32x1xf32> to vector<32x128xf32>
    %13 = vector.broadcast %6 : vector<1x128xf32> to vector<32x128xf32>
    %14 = arith.mulf %12, %13 : vector<32x128xf32>
    %15 = arith.addf %10, %14 : vector<32x128xf32>
    %16 = vector.broadcast %2 : vector<32x1xf32> to vector<32x128xf32>
    %17 = arith.addf %15, %16 : vector<32x128xf32>
    %18 = math.tanh %17 : vector<32x128xf32>
    %19 = vector.extract_strided_slice %3 {offsets = [0, 0], sizes = [32, 1], strides = [1, 1]} : vector<32x2xf32> to vector<32x1xf32>
    %20 = vector.broadcast %19 : vector<32x1xf32> to vector<32x128xf32>
    %21 = arith.mulf %20, %18 : vector<32x128xf32>
    %cst = arith.constant dense<0.000000e+00> : vector<128xf32>
    %22 = vector.multi_reduction <add>, %21, %cst [0] : vector<32x128xf32> to vector<128xf32>
    %23 = vector.shape_cast %22 : vector<128xf32> to vector<1x128xf32>
    %24 = vector.extract_strided_slice %4 {offsets = [0, 0], sizes = [1, 1], strides = [1, 1]} : vector<2x1xf32> to vector<1x1xf32>
    %25 = vector.broadcast %24 : vector<1x1xf32> to vector<1x128xf32>
    %26 = arith.addf %23, %25 : vector<1x128xf32>
    %27 = vector.extract_strided_slice %3 {offsets = [0, 1], sizes = [32, 1], strides = [1, 1]} : vector<32x2xf32> to vector<32x1xf32>
    %28 = vector.broadcast %27 : vector<32x1xf32> to vector<32x128xf32>
    %29 = arith.mulf %28, %18 : vector<32x128xf32>
    %cst_9 = arith.constant dense<0.000000e+00> : vector<128xf32>
    %30 = vector.multi_reduction <add>, %29, %cst_9 [0] : vector<32x128xf32> to vector<128xf32>
    %31 = vector.shape_cast %30 : vector<128xf32> to vector<1x128xf32>
    %32 = vector.extract_strided_slice %4 {offsets = [1, 0], sizes = [1, 1], strides = [1, 1]} : vector<2x1xf32> to vector<1x1xf32>
    %33 = vector.broadcast %32 : vector<1x1xf32> to vector<1x128xf32>
    %34 = arith.addf %31, %33 : vector<1x128xf32>
    %c0_10 = arith.constant 0 : index
    %c0_11 = arith.constant 0 : index
    %35 = vector.load %arg6[%c0_10, %c0_11] : memref<2x128xf32, #tpu.memory_space<vmem>>, vector<1x128xf32>
    tpu.vector_store %arg6[%c0_10, %c0_11], %26 {strides = array<i32>} : memref<2x128xf32, #tpu.memory_space<vmem>>, vector<1x128xf32>,
    %c1 = arith.constant 1 : index
    %c0_12 = arith.constant 0 : index
    %36 = vector.load %arg6[%c1, %c0_12] : memref<2x128xf32, #tpu.memory_space<vmem>>, vector<1x128xf32>
    tpu.vector_store %arg6[%c1, %c0_12], %34 {strides = array<i32>} : memref<2x128xf32, #tpu.memory_space<vmem>>, vector<1x128xf32>,
    return
  }
  func.func @transform_0(%arg0: i32) -> (i32, i32) {
    %c0_i32 = arith.constant 0 : i32
    %c0_i32_0 = arith.constant 0 : i32
    return %c0_i32, %arg0 : i32, i32
  }
  func.func @transform_1(%arg0: i32) -> (i32, i32) {
    %c0_i32 = arith.constant 0 : i32
    %c0_i32_0 = arith.constant 0 : i32
    %c0_i32_1 = arith.constant 0 : i32
    return %c0_i32, %c0_i32_0 : i32, i32
  }
  func.func @transform_2(%arg0: i32) -> (i32, i32) {
    %c0_i32 = arith.constant 0 : i32
    %c0_i32_0 = arith.constant 0 : i32
    %c0_i32_1 = arith.constant 0 : i32
    return %c0_i32, %c0_i32_0 : i32, i32
  }
  func.func @transform_3(%arg0: i32) -> (i32, i32) {
    %c0_i32 = arith.constant 0 : i32
    %c0_i32_0 = arith.constant 0 : i32
    %c0_i32_1 = arith.constant 0 : i32
    return %c0_i32, %c0_i32_0 : i32, i32
  }
  func.func @transform_4(%arg0: i32) -> (i32, i32) {
    %c0_i32 = arith.constant 0 : i32
    %c0_i32_0 = arith.constant 0 : i32
    %c0_i32_1 = arith.constant 0 : i32
    return %c0_i32, %c0_i32_0 : i32, i32
  }
  func.func @transform_5(%arg0: i32) -> (i32, i32) {
    %c0_i32 = arith.constant 0 : i32
    %c0_i32_0 = arith.constant 0 : i32
    return %c0_i32, %arg0 : i32, i32
  }
}

</mosaic_0001>

<bundles_post_ra>
// kernel: tpu_custom_call.1
= control target key start
LH: loop header
LB: loop body
LE: loop exit
PB: predicated region body
PF: predicated region fallthrough
CT: control target
= control target key end

     0   :  { %v243_v1 = vmov 1   ;;  %v244_v2 = vmov 0   ;;  %s321_s0 = inlined_call_operand.vmem [shape: f32[2,8], index: 0, kind: input, shape index: {}]   ;;  %s322_s1 = inlined_call_operand.vmem [shape: f32[32,2], index: 1, kind: input, shape index: {}]   ;;  %s323_s2 = inlined_call_operand.vmem [shape: f32[32,1], index: 2, kind: input, shape index: {}]   ;;  %s324_s3 = inlined_call_operand.vmem [shape: f32[32,2], index: 3, kind: input, shape index: {}]   ;;  %s325_s4 = inlined_call_operand.vmem [shape: f32[2,1], index: 4, kind: input, shape index: {}]   ;;  %s326_s5 = inlined_call_operand.hbm [shape: f32[2,8], index: 5, kind: output, shape index: {}]  }
   0x1   :  { %v22_v0 = vld [vmem:[%s322_s1] sm:$0xff]  ;;  %208 = vset.pattern.permute.xlu1 %v243_v1  ;;  %207 = vset.pattern.permute.xlu0 %v244_v2  ;;  %v23_v3 = vld [vmem:[%s322_s1 + $0x8] sm:$0xff] }
   0x2   :  { %64 = vperm.xlu1 %208, %v22_v0   ;;  %37 = vperm.xlu0 %207, %v22_v0  }
   0x3   :  { %10 = vsyncpa [#allocation3], 0  ;;  %v24_v4 = vld [vmem:[%s322_s1 + $0x10] sm:$0xff]  ;;  %v25_v5 = vld [vmem:[%s322_s1 + $0x18] sm:$0xff]  ;;  %v55_v15 = vlaneseq }
   0x4   :  { %v26_v6 = vld [vmem:[%s323_s2] sm:$0xff]  ;;  %v27_v7 = vld [vmem:[%s323_s2 + $0x8] sm:$0xff]  ;;  %v28_v8 = vld [vmem:[%s323_s2 + $0x10] sm:$0xff] }
   0x5   :  { %v29_v9 = vld [vmem:[%s323_s2 + $0x18] sm:$0xff]  ;;  %v30_v10 = vld [vmem:[%s324_s3] sm:$0xff]  ;;  %v31_v11 = vld [vmem:[%s324_s3 + $0x8] sm:$0xff]  ;;  %v56_v16 = vshrl.u32 %v55_v15, 7 }
   0x6   :  { %68 = vperm.xlu1 %208, %v23_v3   ;;  %42 = vperm.xlu0 %207, %v23_v3   ;;  %v32_v12 = vld [vmem:[%s324_s3 + $0x10] sm:$0xff]  ;;  %v33_v13 = vld [vmem:[%s324_s3 + $0x18] sm:$0xff]  ;;  %v34_v14 = vld [vmem:[%s325_s4] sm:$0x3] }
   0x7   :  { %v81_v19 = vsub.s32 1, %v56_v16  ;;  %v57_v20 = vsub.s32 0, %v56_v16  ;;  %v21_v21 = vld [vmem:[%s321_s0] sm:$0x3]  ;;  %s245_s0 = smov [#allocation2]  }
   0x8   :  { %s196_s3 = sshll.u32 %s245_s0, 4  ;;  %s197_s3 = int_to_ptr.vmem [resolvable:$true] %s196_s3 }
   0x9   :  { %v82_v24 = vrot.slane %v21_v21, %v81_v19  ;;  %v58_v25 = vrot.slane %v21_v21, %v57_v20  ;;  %s221_s4 = scalar_lea.vmem %s197_s3, 32  ;;  %p226_p1 = scmp.lt.s32.totalorder %s197_s3, %s197_s3 }
   0xa   :  { %72 = vperm.xlu1 %208, %v24_v4   ;;  %47 = vperm.xlu0 %207, %v24_v4   ;;  %p222_p0 = scmp.ne.s32.totalorder %s197_s3, %s221_s4  ;;  %p227_p2 = scmp.lt.s32.totalorder %s221_s4, %s221_s4 }
   0xc   :  { %p228_p3 = por %p227_p2, %p226_p1 }
   0xe   :  { %76 = vperm.xlu1 %208, %v25_v5   ;;  %52 = vperm.xlu0 %207, %v25_v5   ;;  %p229_p4 = pnand %p228_p3, %p222_p0 }
  0x12   :  { %209 = vset.pattern.permute.xlu1 %v244_v2  ;;  %93 = vperm.xlu0 %207, %v26_v6  }
  0x13   :  { %98 = vperm.xlu1 %209, %v27_v7  }
  0x16   :  { %103 = vperm.xlu0 %207, %v28_v8  }
  0x17   :  { %108 = vperm.xlu1 %209, %v29_v9  }
  0x1a   :  { %121 = vperm.xlu0 %207, %v30_v10  }
  0x1b   :  { %126 = vperm.xlu1 %209, %v31_v11  }
  0x1e   :  { %210 = vset.pattern.permute.xlu0 %v243_v1 }
  0x1f   :  { %211 = vset.pattern.permute.xlu1 %v243_v1  ;;  %159 = vperm.xlu0 %210, %v30_v10  }
  0x20   :  { %163 = vperm.xlu1 %211, %v31_v11  }
  0x23   :  { %167 = vperm.xlu0 %210, %v32_v12  }
  0x24   :  { %212 = vset.pattern.permute.xlu1 %v244_v2 }
  0x25   :  { %131 = vperm.xlu1 %212, %v32_v12  }
  0x27   :  { %171 = vperm.xlu0 %210, %v33_v13  }
  0x29   :  { %136 = vperm.xlu1 %212, %v33_v13  }
  0x2d   :  { %154 = vperm.xlu1 %212, %v34_v14  }
  0x7d   :  { %v65_v17 = vpop.permute.xlu1 %64  ;;  %v38_v18 = vpop.permute.xlu0 %37 }
  0x7e   :  { %v83_v28 = vmul.f32 %v82_v24, %v65_v17  ;;  %v59_v29 = vmul.f32 %v58_v25, %v38_v18 }
  0x80   :  { %v87_v36 = vadd.f32 %v83_v28, %v59_v29 }
  0x81   :  { %v69_v22 = vpop.permute.xlu1 %68  ;;  %v43_v23 = vpop.permute.xlu0 %42 }
  0x82   :  { %v84_v30 = vmul.f32 %v82_v24, %v69_v22  ;;  %v60_v31 = vmul.f32 %v58_v25, %v43_v23 }
  0x84   :  { %v88_v40 = vadd.f32 %v84_v30, %v60_v31 }
  0x85   :  { %v73_v26 = vpop.permute.xlu1 %72  ;;  %v48_v27 = vpop.permute.xlu0 %47 }
  0x86   :  { %v85_v34 = vmul.f32 %v82_v24, %v73_v26  ;;  %v61_v35 = vmul.f32 %v58_v25, %v48_v27 }
  0x88   :  { %v89_v44 = vadd.f32 %v85_v34, %v61_v35 }
  0x89   :  { %v77_v32 = vpop.permute.xlu1 %76  ;;  %v53_v33 = vpop.permute.xlu0 %52 }
  0x8a   :  { %v86_v37 = vmul.f32 %v82_v24, %v77_v32  ;;  %v62_v38 = vmul.f32 %v58_v25, %v53_v33 }
  0x8c   :  { %v90_v46 = vadd.f32 %v86_v37, %v62_v38 }
  0x8d   :  { %v94_v39 = vpop.permute.xlu0 %93 }
  0x8e   :  { %v111_v41 = vadd.f32 %v94_v39, %v87_v36  ;;  %v99_v42 = vpop.permute.xlu1 %98 }
  0x8f   :  { %v112_v43 = vadd.f32 %v99_v42, %v88_v40 }
  0x90   :  { %213 = vtanh.f32 %v111_v41 }
  0x91   :  { %215 = vtanh.f32 %v112_v43  ;;  %v104_v45 = vpop.permute.xlu0 %103 }
  0x92   :  { %v113_v47 = vadd.f32 %v104_v45, %v89_v44  ;;  %v109_v48 = vpop.permute.xlu1 %108 }
  0x93   :  { %v114_v49 = vadd.f32 %v109_v48, %v90_v46 }
  0x94   :  { %217 = vtanh.f32 %v113_v47 }
  0x95   :  { %219 = vtanh.f32 %v114_v49  ;;  %v122_v50 = vpop.permute.xlu0 %121 }
  0x96   :  { %v127_v51 = vpop.permute.xlu1 %126 }
  0x9a   :  { %v160_v52 = vpop.permute.xlu0 %159 }
  0x9b   :  { %v164_v53 = vpop.permute.xlu1 %163 }
  0x9d   :  { %v214_v54 = vpop.eup %213 }
  0x9e   :  { %v216_v55 = vpop.eup %215  ;;  %v139_v56 = vmul.f32 %v214_v54, %v122_v50  ;;  %v174_v57 = vmul.f32 %v214_v54, %v160_v52  ;;  %v168_v58 = vpop.permute.xlu0 %167 }
  0x9f   :  { %v140_v59 = vmul.f32 %v216_v55, %v127_v51  ;;  %v175_v60 = vmul.f32 %v216_v55, %v164_v53 }
  0xa0   :  { %v132_v61 = vpop.permute.xlu1 %131 }
  0xa1   :  { %v218_v62 = vpop.eup %217  ;;  %v143_v63 = vadd.f32 %v140_v59, %v139_v56  ;;  %v178_v0 = vadd.f32 %v175_v60, %v174_v57 }
  0xa2   :  { %v220_v1 = vpop.eup %219  ;;  %v176_v2 = vmul.f32 %v218_v62, %v168_v58  ;;  %v141_v3 = vmul.f32 %v218_v62, %v132_v61  ;;  %v172_v4 = vpop.permute.xlu0 %171 }
  0xa3   :  { %v177_v5 = vmul.f32 %v220_v1, %v172_v4 }
  0xa4   :  { %v179_v6 = vadd.f32 %v178_v0, %v176_v2  ;;  %v144_v7 = vadd.f32 %v143_v63, %v141_v3  ;;  %v137_v8 = vpop.permute.xlu1 %136 }
  0xa5   :  { %v142_v9 = vmul.f32 %v220_v1, %v137_v8 }
  0xa6   :  { %v180_v10 = vadd.f32 %v179_v6, %v177_v5 }
  0xa7   :  { %v145_v11 = vadd.f32 %v144_v7, %v142_v9 }
  0xa8   :  { %v181_v12 = vrot.slane %v180_v10, 4  ;;  %v155_v23 = vpop.permute.xlu1 %154 }
  0xa9   :  { %v146_v13 = vrot.slane %v145_v11, 4 }
  0xaa   :  { %v182_v14 = vadd.f32 %v181_v12, %v180_v10 }
  0xab   :  { %v147_v15 = vadd.f32 %v146_v13, %v145_v11 }
  0xac   :  { %v183_v16 = vrot.slane %v182_v14, 2 }
  0xad   :  { %v148_v17 = vrot.slane %v147_v15, 2 }
  0xae   :  { %v184_v18 = vadd.f32 %v183_v16, %v182_v14 }
  0xaf   :  { %v149_v19 = vadd.f32 %v148_v17, %v147_v15 }
  0xb0   :  { %v185_v20 = vrot.slane %v184_v18, 1 }
  0xb1   :  { %v150_v21 = vrot.slane %v149_v19, 1 }
  0xb2   :  { %v186_v22 = vadd.f32 %v185_v20, %v184_v18 }
  0xb3   :  { %v151_v24 = vadd.f32 %v150_v21, %v149_v19 }
  0xb4   :  { %v187_v25 = vadd.f32 %v186_v22, %v155_v23 }
  0xb5   :  { %v157_v26 = vadd.f32 %v155_v23, %v151_v24 }
  0xb6   :  { %189 = vst [vmem:[#allocation2] sm:$0x2] %v187_v25 }
  0xb7   :  { %188 = vst [vmem:[#allocation2] sm:$0x1] %v157_v26 }
  0xb8   :  { %232 = shalt.err (!%p229_p4)
}
  0xb9   :  { %199 = dma.vmem_to_hbm [thread:$0]  %s197_s3, 32, %s326_s5, [#allocation3]  }
  0xba   :  { %241 = dma.done.wait [#allocation3], 32  }
  0xbb   :  { %242 = vsyncadd [#allocation3], 4294967264 }
  0xbc   :  { %203 = vsyncpa [#allocation3], 1 }

</bundles_post_ra>
